<compile_context>
chip_gen: v6e
topology: v6e:2x2x1
jax: 0.10.0
libtpu: 0.0.40
codegen_flags: <defaults>
</compile_context>

<pallas_src>
import functools
import math

import jax
import jax.numpy as jnp
from jax.experimental import pallas as pl
from jax.experimental.pallas import tpu as pltpu

_LANE = 128      # lane width (last dim)
_SUBLANE = 8     # sublane width (second-to-last dim)
_MiB = 1024 * 1024


def _round_up(x, m):
    return ((x + m - 1) // m) * m


def _choose_tile_m(batch):
    """Static batch-tile choice.

    - small batch : one exact tile (no padding waste, 1 grid step)
    - mid batch   : exactly 2 tiles so v7x's two TensorCores both get work
    - large batch : 256/512-row tiles to amortize the ~0.35us per-grid-step
      overhead (mem-bound kernels reach ~85% of HBM roofline at >=512 rows).
    """
    batch_pad = _round_up(batch, _SUBLANE)
    if batch <= 64:
        return batch_pad
    if batch <= 256:
        return _round_up(pl.cdiv(batch_pad, 2), _SUBLANE)
    if batch <= 2048:
        return 256
    return 512


def _vmem_limit_bytes(weights, biases, tile_m, x_itemsize, out_itemsize,
                      single_buffer_weights):
    """Scoped-VMEM budget: resident weights + pipelined tiles, +25% headroom."""
    wb_bufs = 1 if single_buffer_weights else 2
    w_bytes = sum(int(w.size) * w.dtype.itemsize for w in weights) * wb_bufs
    b_bytes = sum(int(b.size) * b.dtype.itemsize for b in biases) * wb_bufs
    din_pad = weights[0].shape[0]
    dout_pad = weights[-1].shape[1]
    max_width = max(w.shape[1] for w in weights)
    x_bytes = tile_m * din_pad * x_itemsize * 2       # double-buffered input tile
    o_bytes = tile_m * dout_pad * out_itemsize * 2    # double-buffered output tile
    act_bytes = tile_m * max_width * 4 * 2            # live f32 activations
    total = int((w_bytes + b_bytes + x_bytes + o_bytes + act_bytes) * 1.25)
    return max(32 * _MiB, min(total, 96 * _MiB))


def _mlp_kernel(x_ref, *refs, n_layers, negative_slope):
    """Fused MLP kernel.

    x_ref:  [tile_m, din_pad]            (VMEM, matmul dtype, e.g. bf16)
    refs:   w_0, b_0, ..., w_{L-1}, b_{L-1}, o_ref
            w_i: [din_pad_i, dout_pad_i] (VMEM, matmul dtype, pre-transposed)
            b_i: [1, dout_pad_i]         (VMEM, f32)
    o_ref:  [tile_m, dout_pad_last]      (VMEM, out dtype)
    """
    o_ref = refs[-1]
    wb = refs[:-1]

    h = x_ref[...]                      # already in matmul dtype; no f32 trip
    for i in range(n_layers):           # unrolled; activations stay in VMEM
        w = wb[2 * i][...]
        b = wb[2 * i + 1][...]          # f32, broadcast over rows
        lhs = h if h.dtype == w.dtype else h.astype(w.dtype)
        y = jnp.dot(lhs, w, preferred_element_type=jnp.float32) + b
        if i < n_layers - 1:
            # LeakyReLU (torch default slope 0.01): valid for 0 < slope < 1.
            y = jnp.maximum(y, jnp.float32(negative_slope) * y)
        h = y
    o_ref[...] = h.astype(o_ref.dtype)


def _fused_mlp_forward(x, weights, biases, *, negative_slope, out_features,
                       matmul_dtype, out_dtype, single_buffer_weights):
    """Single pallas_call for the whole MLP.  weights/biases are pre-padded."""
    batch, din = x.shape
    n_layers = len(weights)
    din_pad = weights[0].shape[0]
    dout_pad = weights[-1].shape[1]

    tile_m = _choose_tile_m(batch)
    batch_pad = _round_up(batch, _SUBLANE)
    grid_m = pl.cdiv(batch_pad, tile_m)   # partial last tile: garbage rows are
                                          # row-independent and sliced off below

    # Feed the kernel in the matmul dtype; pad only if actually needed.
    x = x.astype(matmul_dtype)
    if batch_pad != batch or din_pad != din:
        x = jnp.pad(x, ((0, batch_pad - batch), (0, din_pad - din)))

    def _invariant_spec(shape):
        # Weight/bias blocks never change across the batch grid -> no need to
        # double-buffer them (halves their VMEM footprint).
        if single_buffer_weights:
            return pl.BlockSpec(shape, lambda i: (0, 0),
                                pipeline_mode=pl.Buffered(1))
        return pl.BlockSpec(shape, lambda i: (0, 0))

    in_specs = [pl.BlockSpec((tile_m, din_pad), lambda i: (i, 0))]
    flat_args = [x]
    for w, b in zip(weights, biases):
        in_specs.append(_invariant_spec(w.shape))
        in_specs.append(_invariant_spec(b.shape))
        flat_args.extend((w, b))

    out_spec = pl.BlockSpec((tile_m, dout_pad), lambda i: (i, 0))

    kernel = functools.partial(
        _mlp_kernel, n_layers=n_layers, negative_slope=negative_slope)

    vmem_limit = _vmem_limit_bytes(
        weights, biases, tile_m,
        x_itemsize=jnp.dtype(matmul_dtype).itemsize,
        out_itemsize=jnp.dtype(out_dtype).itemsize,
        single_buffer_weights=single_buffer_weights)

    out = pl.pallas_call(
        kernel,
        out_shape=jax.ShapeDtypeStruct((batch_pad, dout_pad), out_dtype),
        grid=(grid_m,),
        in_specs=in_specs,
        out_specs=out_spec,
        compiler_params=pltpu.CompilerParams(
            dimension_semantics=("parallel",),
            vmem_limit_bytes=vmem_limit),
    )(*flat_args)

    return out[:batch, :out_features]


class FullyConnectedNetworkPallas:
    """JAX/Pallas port of the PyTorch FullyConnectedNetwork module."""

    def __init__(self, input_size, layer_sizes, output_size, activation=None,
                 key=None, negative_slope=0.01, matmul_dtype=jnp.bfloat16,
                 out_dtype=jnp.float32):
        if key is None:
            key = jax.random.PRNGKey(0)
        size_list = [input_size] + list(layer_sizes) + [output_size]
        self.input_size = input_size
        self.output_size = output_size
        self.negative_slope = float(negative_slope)
        self.matmul_dtype = jnp.dtype(matmul_dtype)
        self.out_dtype = jnp.dtype(out_dtype)

        weights_f32, biases_f32, weights, biases = [], [], [], []
        for i in range(len(size_list) - 1):
            fan_in, fan_out = size_list[i], size_list[i + 1]
            key, wk, bk = jax.random.split(key, 3)
            # Deterministic init mimicking torch.nn.Linear's uniform bounds.
            bound = 1.0 / math.sqrt(fan_in)
            w = jax.random.uniform(wk, (fan_in, fan_out), jnp.float32,
                                   minval=-bound, maxval=bound)
            b = jax.random.uniform(bk, (fan_out,), jnp.float32,
                                   minval=-bound, maxval=bound)
            weights_f32.append(w)
            biases_f32.append(b)
            # Pad once at init: lane-dense (multiple-of-128) feature dims,
            # zero-filled so no garbage leaks into the next layer.
            din_pad = _round_up(fan_in, _LANE)
            dout_pad = _round_up(fan_out, _LANE)
            w_pad = jnp.zeros((din_pad, dout_pad), self.matmul_dtype)
            w_pad = w_pad.at[:fan_in, :fan_out].set(w.astype(self.matmul_dtype))
            b_pad = jnp.zeros((1, dout_pad), jnp.float32)
            b_pad = b_pad.at[0, :fan_out].set(b)
            weights.append(w_pad)
            biases.append(b_pad)

        self.weights_f32 = tuple(weights_f32)  # unpadded f32 (reference / export)
        self.biases_f32 = tuple(biases_f32)
        self.weights = tuple(weights)          # padded, matmul dtype
        self.biases = tuple(biases)            # padded, f32, [1, dout_pad]

        # Optional trailing activation: supported if it is a JAX callable.
        # TODO(synk): translate arbitrary torch activation modules if needed.
        self.activation = activation

        self._forward = self._make_forward(single_buffer_weights=True)

    def _make_forward(self, single_buffer_weights):
        return jax.jit(functools.partial(
            _fused_mlp_forward,
            negative_slope=self.negative_slope,
            out_features=self.output_size,
            matmul_dtype=self.matmul_dtype,
            out_dtype=self.out_dtype,
            single_buffer_weights=single_buffer_weights))

    def __call__(self, x):
        x = jnp.asarray(x)
        try:
            y = self._forward(x, self.weights, self.biases)
        except Exception:
            # Fallback for jax versions that reject pipeline_mode=pl.Buffered(1)
            # on pallas_call BlockSpecs: use default double-buffered weights.
            self._forward = self._make_forward(single_buffer_weights=False)
            y = self._forward(x, self.weights, self.biases)
        if self.activation is not None:
            y = self.activation(y)
        return y


def _reference_forward_quantized(net, x):
    """Pure-jnp reference using the SAME padded matmul-dtype params (tight)."""
    din = x.shape[1]
    din_pad = net.weights[0].shape[0]
    h = jnp.pad(x.astype(net.matmul_dtype), ((0, 0), (0, din_pad - din)))
    n = len(net.weights)
    for i, (w, b) in enumerate(zip(net.weights, net.biases)):
        lhs = h if h.dtype == w.dtype else h.astype(w.dtype)
        y = jnp.dot(lhs, w, preferred_element_type=jnp.float32) + b
        if i < n - 1:
            y = jnp.maximum(y, net.negative_slope * y)
        h = y
    out = h[:, :net.output_size].astype(net.out_dtype)
    if net.activation is not None:
        out = net.activation(out)
    return out


def _reference_forward_f32(net, x):
    """True float32 reference (unpadded f32 params, highest matmul precision)."""
    h = x.astype(jnp.float32)
    n = len(net.weights_f32)
    for i, (w, b) in enumerate(zip(net.weights_f32, net.biases_f32)):
        y = jnp.dot(h, w, precision=jax.lax.Precision.HIGHEST) + b
        if i < n - 1:
            y = jnp.where(y > 0, y, net.negative_slope * y)
        h = y
    if net.activation is not None:
        h = net.activation(h)
    return h


if __name__ == "__main__":
    key = jax.random.PRNGKey(0)
    key, xk = jax.random.split(key)

    batch = 8
    input_size = 32
    layer_sizes = [64, 48]
    output_size = 16

    x = jax.random.normal(xk, (batch, input_size), jnp.float32)

    net = FullyConnectedNetworkPallas(
        input_size, layer_sizes, output_size, activation=None, key=key)

    out = jax.block_until_ready(net(x))
    assert out.shape == (batch, output_size), out.shape

    # Tight check: kernel vs jnp using identical padded bf16 params.
    ref_q = _reference_forward_quantized(net, x)
    assert jnp.allclose(out, ref_q, atol=1e-3, rtol=1e-3), "mismatch vs bf16 ref"

    # Non-circular check: kernel vs true float32 Linear stack (tolerance covers
    # the bf16 weight/input quantization of the fast path).
    ref_f32 = _reference_forward_f32(net, x)
    assert jnp.allclose(out, ref_f32, atol=1e-1, rtol=1e-1), "mismatch vs f32 ref"

    print("KERNEL_OK")
</pallas_src>

<mosaic_0001>
module attributes {stable_mosaic.version = 11 : i64} {
  func.func @_mlp_kernel(%arg0: i32, %arg1: memref<8x128xbf16, #tpu.memory_space<vmem>>, %arg2: memref<128x128xbf16, #tpu.memory_space<vmem>>, %arg3: memref<1x128xf32, #tpu.memory_space<vmem>>, %arg4: memref<128x128xbf16, #tpu.memory_space<vmem>>, %arg5: memref<1x128xf32, #tpu.memory_space<vmem>>, %arg6: memref<128x128xbf16, #tpu.memory_space<vmem>>, %arg7: memref<1x128xf32, #tpu.memory_space<vmem>>, %arg8: memref<8x128xf32, #tpu.memory_space<vmem>>) attributes {dimension_semantics = [#tpu.dimension_semantics<parallel>], iteration_bounds = array<i64: 1>, scalar_prefetch = 0 : i64, scratch_operands = 0 : i64, tpu.core_type = #tpu.core_type<tc>, window_params = [{transform_indices = @transform_0, window_bounds = array<i64: 8, 128>}, {pipeline_mode = #tpu.pipeline_mode<synchronous>, transform_indices = @transform_1, window_bounds = array<i64: 128, 128>}, {pipeline_mode = #tpu.pipeline_mode<synchronous>, transform_indices = @transform_2, window_bounds = array<i64: 1, 128>}, {pipeline_mode = #tpu.pipeline_mode<synchronous>, transform_indices = @transform_3, window_bounds = array<i64: 128, 128>}, {pipeline_mode = #tpu.pipeline_mode<synchronous>, transform_indices = @transform_4, window_bounds = array<i64: 1, 128>}, {pipeline_mode = #tpu.pipeline_mode<synchronous>, transform_indices = @transform_5, window_bounds = array<i64: 128, 128>}, {pipeline_mode = #tpu.pipeline_mode<synchronous>, transform_indices = @transform_6, window_bounds = array<i64: 1, 128>}, {transform_indices = @transform_7, window_bounds = array<i64: 8, 128>}]} {
    %c0 = arith.constant 0 : index
    %c0_0 = arith.constant 0 : index
    %0 = vector.load %arg1[%c0, %c0_0] : memref<8x128xbf16, #tpu.memory_space<vmem>>, vector<8x128xbf16>
    %c0_1 = arith.constant 0 : index
    %c0_2 = arith.constant 0 : index
    %1 = vector.load %arg2[%c0_1, %c0_2] : memref<128x128xbf16, #tpu.memory_space<vmem>>, vector<128x128xbf16>
    %c0_3 = arith.constant 0 : index
    %c0_4 = arith.constant 0 : index
    %2 = vector.load %arg3[%c0_3, %c0_4] : memref<1x128xf32, #tpu.memory_space<vmem>>, vector<1x128xf32>
    %cst = arith.constant dense<0.000000e+00> : vector<8x128xf32>
    %3 = tpu.matmul %0, %1, %cst {dimension_numbers = #tpu.dot_dimension_numbers<[1], [0], [0], [1], [0, 0, 1, 1], [], []>} : vector<8x128xbf16>, vector<128x128xbf16>, vector<8x128xf32> -> vector<8x128xf32>
    %4 = vector.broadcast %2 : vector<1x128xf32> to vector<8x128xf32>
    %5 = arith.addf %3, %4 : vector<8x128xf32>
    %cst_5 = arith.constant 0.00999999977 : f32
    %6 = vector.broadcast %cst_5 : f32 to vector<8x128xf32>
    %7 = arith.mulf %6, %5 : vector<8x128xf32>
    %8 = arith.maximumf %5, %7 : vector<8x128xf32>
    %c0_6 = arith.constant 0 : index
    %c0_7 = arith.constant 0 : index
    %9 = vector.load %arg4[%c0_6, %c0_7] : memref<128x128xbf16, #tpu.memory_space<vmem>>, vector<128x128xbf16>
    %c0_8 = arith.constant 0 : index
    %c0_9 = arith.constant 0 : index
    %10 = vector.load %arg5[%c0_8, %c0_9] : memref<1x128xf32, #tpu.memory_space<vmem>>, vector<1x128xf32>
    %11 = arith.truncf %8 : vector<8x128xf32> to vector<8x128xbf16>
    %cst_10 = arith.constant dense<0.000000e+00> : vector<8x128xf32>
    %12 = tpu.matmul %11, %9, %cst_10 {dimension_numbers = #tpu.dot_dimension_numbers<[1], [0], [0], [1], [0, 0, 1, 1], [], []>} : vector<8x128xbf16>, vector<128x128xbf16>, vector<8x128xf32> -> vector<8x128xf32>
    %13 = vector.broadcast %10 : vector<1x128xf32> to vector<8x128xf32>
    %14 = arith.addf %12, %13 : vector<8x128xf32>
    %cst_11 = arith.constant 0.00999999977 : f32
    %15 = vector.broadcast %cst_11 : f32 to vector<8x128xf32>
    %16 = arith.mulf %15, %14 : vector<8x128xf32>
    %17 = arith.maximumf %14, %16 : vector<8x128xf32>
    %c0_12 = arith.constant 0 : index
    %c0_13 = arith.constant 0 : index
    %18 = vector.load %arg6[%c0_12, %c0_13] : memref<128x128xbf16, #tpu.memory_space<vmem>>, vector<128x128xbf16>
    %c0_14 = arith.constant 0 : index
    %c0_15 = arith.constant 0 : index
    %19 = vector.load %arg7[%c0_14, %c0_15] : memref<1x128xf32, #tpu.memory_space<vmem>>, vector<1x128xf32>
    %20 = arith.truncf %17 : vector<8x128xf32> to vector<8x128xbf16>
    %cst_16 = arith.constant dense<0.000000e+00> : vector<8x128xf32>
    %21 = tpu.matmul %20, %18, %cst_16 {dimension_numbers = #tpu.dot_dimension_numbers<[1], [0], [0], [1], [0, 0, 1, 1], [], []>} : vector<8x128xbf16>, vector<128x128xbf16>, vector<8x128xf32> -> vector<8x128xf32>
    %22 = vector.broadcast %19 : vector<1x128xf32> to vector<8x128xf32>
    %23 = arith.addf %21, %22 : vector<8x128xf32>
    %c0_17 = arith.constant 0 : index
    %c0_18 = arith.constant 0 : index
    %24 = vector.load %arg8[%c0_17, %c0_18] : memref<8x128xf32, #tpu.memory_space<vmem>>, vector<8x128xf32>
    tpu.vector_store %arg8[%c0_17, %c0_18], %23 {strides = array<i32>} : memref<8x128xf32, #tpu.memory_space<vmem>>, vector<8x128xf32>,
    return
  }
  func.func @transform_0(%arg0: i32) -> (i32, i32) {
    %c0_i32 = arith.constant 0 : i32
    %c0_i32_0 = arith.constant 0 : i32
    return %arg0, %c0_i32 : i32, i32
  }
  func.func @transform_1(%arg0: i32) -> (i32, i32) {
    %c0_i32 = arith.constant 0 : i32
    %c0_i32_0 = arith.constant 0 : i32
    %c0_i32_1 = arith.constant 0 : i32
    return %c0_i32, %c0_i32_0 : i32, i32
  }
  func.func @transform_2(%arg0: i32) -> (i32, i32) {
    %c0_i32 = arith.constant 0 : i32
    %c0_i32_0 = arith.constant 0 : i32
    %c0_i32_1 = arith.constant 0 : i32
    return %c0_i32, %c0_i32_0 : i32, i32
  }
  func.func @transform_3(%arg0: i32) -> (i32, i32) {
    %c0_i32 = arith.constant 0 : i32
    %c0_i32_0 = arith.constant 0 : i32
    %c0_i32_1 = arith.constant 0 : i32
    return %c0_i32, %c0_i32_0 : i32, i32
  }
  func.func @transform_4(%arg0: i32) -> (i32, i32) {
    %c0_i32 = arith.constant 0 : i32
    %c0_i32_0 = arith.constant 0 : i32
    %c0_i32_1 = arith.constant 0 : i32
    return %c0_i32, %c0_i32_0 : i32, i32
  }
  func.func @transform_5(%arg0: i32) -> (i32, i32) {
    %c0_i32 = arith.constant 0 : i32
    %c0_i32_0 = arith.constant 0 : i32
    %c0_i32_1 = arith.constant 0 : i32
    return %c0_i32, %c0_i32_0 : i32, i32
  }
  func.func @transform_6(%arg0: i32) -> (i32, i32) {
    %c0_i32 = arith.constant 0 : i32
    %c0_i32_0 = arith.constant 0 : i32
    %c0_i32_1 = arith.constant 0 : i32
    return %c0_i32, %c0_i32_0 : i32, i32
  }
  func.func @transform_7(%arg0: i32) -> (i32, i32) {
    %c0_i32 = arith.constant 0 : i32
    %c0_i32_0 = arith.constant 0 : i32
    return %arg0, %c0_i32 : i32, i32
  }
}

module attributes {stable_mosaic.version = 11 : i64} {
  func.func @_mlp_kernel(%arg0: i32, %arg1: memref<8x128xbf16, #tpu.memory_space<vmem>>, %arg2: memref<128x128xbf16, #tpu.memory_space<vmem>>, %arg3: memref<1x128xf32, #tpu.memory_space<vmem>>, %arg4: memref<128x128xbf16, #tpu.memory_space<vmem>>, %arg5: memref<1x128xf32, #tpu.memory_space<vmem>>, %arg6: memref<128x128xbf16, #tpu.memory_space<vmem>>, %arg7: memref<1x128xf32, #tpu.memory_space<vmem>>, %arg8: memref<8x128xf32, #tpu.memory_space<vmem>>) attributes {dimension_semantics = [#tpu.dimension_semantics<parallel>], iteration_bounds = array<i64: 1>, scalar_prefetch = 0 : i64, scratch_operands = 0 : i64, tpu.core_type = #tpu.core_type<tc>, window_params = [{transform_indices = @transform_0, window_bounds = array<i64: 8, 128>}, {pipeline_mode = #tpu.pipeline_mode<synchronous>, transform_indices = @transform_1, window_bounds = array<i64: 128, 128>}, {pipeline_mode = #tpu.pipeline_mode<synchronous>, transform_indices = @transform_2, window_bounds = array<i64: 1, 128>}, {pipeline_mode = #tpu.pipeline_mode<synchronous>, transform_indices = @transform_3, window_bounds = array<i64: 128, 128>}, {pipeline_mode = #tpu.pipeline_mode<synchronous>, transform_indices = @transform_4, window_bounds = array<i64: 1, 128>}, {pipeline_mode = #tpu.pipeline_mode<synchronous>, transform_indices = @transform_5, window_bounds = array<i64: 128, 128>}, {pipeline_mode = #tpu.pipeline_mode<synchronous>, transform_indices = @transform_6, window_bounds = array<i64: 1, 128>}, {transform_indices = @transform_7, window_bounds = array<i64: 8, 128>}]} {
    %c0 = arith.constant 0 : index
    %c0_0 = arith.constant 0 : index
    %0 = vector.load %arg1[%c0, %c0_0] : memref<8x128xbf16, #tpu.memory_space<vmem>>, vector<8x128xbf16>
    %c0_1 = arith.constant 0 : index
    %c0_2 = arith.constant 0 : index
    %1 = vector.load %arg2[%c0_1, %c0_2] : memref<128x128xbf16, #tpu.memory_space<vmem>>, vector<128x128xbf16>
    %c0_3 = arith.constant 0 : index
    %c0_4 = arith.constant 0 : index
    %2 = vector.load %arg3[%c0_3, %c0_4] : memref<1x128xf32, #tpu.memory_space<vmem>>, vector<1x128xf32>
    %cst = arith.constant dense<0.000000e+00> : vector<8x128xf32>
    %3 = tpu.matmul %0, %1, %cst {dimension_numbers = #tpu.dot_dimension_numbers<[1], [0], [0], [1], [0, 0, 1, 1], [], []>} : vector<8x128xbf16>, vector<128x128xbf16>, vector<8x128xf32> -> vector<8x128xf32>
    %4 = vector.broadcast %2 : vector<1x128xf32> to vector<8x128xf32>
    %5 = arith.addf %3, %4 : vector<8x128xf32>
    %cst_5 = arith.constant 0.00999999977 : f32
    %6 = vector.broadcast %cst_5 : f32 to vector<8x128xf32>
    %7 = arith.mulf %6, %5 : vector<8x128xf32>
    %8 = arith.maximumf %5, %7 : vector<8x128xf32>
    %c0_6 = arith.constant 0 : index
    %c0_7 = arith.constant 0 : index
    %9 = vector.load %arg4[%c0_6, %c0_7] : memref<128x128xbf16, #tpu.memory_space<vmem>>, vector<128x128xbf16>
    %c0_8 = arith.constant 0 : index
    %c0_9 = arith.constant 0 : index
    %10 = vector.load %arg5[%c0_8, %c0_9] : memref<1x128xf32, #tpu.memory_space<vmem>>, vector<1x128xf32>
    %11 = arith.truncf %8 : vector<8x128xf32> to vector<8x128xbf16>
    %cst_10 = arith.constant dense<0.000000e+00> : vector<8x128xf32>
    %12 = tpu.matmul %11, %9, %cst_10 {dimension_numbers = #tpu.dot_dimension_numbers<[1], [0], [0], [1], [0, 0, 1, 1], [], []>} : vector<8x128xbf16>, vector<128x128xbf16>, vector<8x128xf32> -> vector<8x128xf32>
    %13 = vector.broadcast %10 : vector<1x128xf32> to vector<8x128xf32>
    %14 = arith.addf %12, %13 : vector<8x128xf32>
    %cst_11 = arith.constant 0.00999999977 : f32
    %15 = vector.broadcast %cst_11 : f32 to vector<8x128xf32>
    %16 = arith.mulf %15, %14 : vector<8x128xf32>
    %17 = arith.maximumf %14, %16 : vector<8x128xf32>
    %c0_12 = arith.constant 0 : index
    %c0_13 = arith.constant 0 : index
    %18 = vector.load %arg6[%c0_12, %c0_13] : memref<128x128xbf16, #tpu.memory_space<vmem>>, vector<128x128xbf16>
    %c0_14 = arith.constant 0 : index
    %c0_15 = arith.constant 0 : index
    %19 = vector.load %arg7[%c0_14, %c0_15] : memref<1x128xf32, #tpu.memory_space<vmem>>, vector<1x128xf32>
    %20 = arith.truncf %17 : vector<8x128xf32> to vector<8x128xbf16>
    %cst_16 = arith.constant dense<0.000000e+00> : vector<8x128xf32>
    %21 = tpu.matmul %20, %18, %cst_16 {dimension_numbers = #tpu.dot_dimension_numbers<[1], [0], [0], [1], [0, 0, 1, 1], [], []>} : vector<8x128xbf16>, vector<128x128xbf16>, vector<8x128xf32> -> vector<8x128xf32>
    %22 = vector.broadcast %19 : vector<1x128xf32> to vector<8x128xf32>
    %23 = arith.addf %21, %22 : vector<8x128xf32>
    %c0_17 = arith.constant 0 : index
    %c0_18 = arith.constant 0 : index
    %24 = vector.load %arg8[%c0_17, %c0_18] : memref<8x128xf32, #tpu.memory_space<vmem>>, vector<8x128xf32>
    tpu.vector_store %arg8[%c0_17, %c0_18], %23 {strides = array<i32>} : memref<8x128xf32, #tpu.memory_space<vmem>>, vector<8x128xf32>,
    return
  }
  func.func @transform_0(%arg0: i32) -> (i32, i32) {
    %c0_i32 = arith.constant 0 : i32
    %c0_i32_0 = arith.constant 0 : i32
    return %arg0, %c0_i32 : i32, i32
  }
  func.func @transform_1(%arg0: i32) -> (i32, i32) {
    %c0_i32 = arith.constant 0 : i32
    %c0_i32_0 = arith.constant 0 : i32
    %c0_i32_1 = arith.constant 0 : i32
    return %c0_i32, %c0_i32_0 : i32, i32
  }
  func.func @transform_2(%arg0: i32) -> (i32, i32) {
    %c0_i32 = arith.constant 0 : i32
    %c0_i32_0 = arith.constant 0 : i32
    %c0_i32_1 = arith.constant 0 : i32
    return %c0_i32, %c0_i32_0 : i32, i32
  }
  func.func @transform_3(%arg0: i32) -> (i32, i32) {
    %c0_i32 = arith.constant 0 : i32
    %c0_i32_0 = arith.constant 0 : i32
    %c0_i32_1 = arith.constant 0 : i32
    return %c0_i32, %c0_i32_0 : i32, i32
  }
  func.func @transform_4(%arg0: i32) -> (i32, i32) {
    %c0_i32 = arith.constant 0 : i32
    %c0_i32_0 = arith.constant 0 : i32
    %c0_i32_1 = arith.constant 0 : i32
    return %c0_i32, %c0_i32_0 : i32, i32
  }
  func.func @transform_5(%arg0: i32) -> (i32, i32) {
    %c0_i32 = arith.constant 0 : i32
    %c0_i32_0 = arith.constant 0 : i32
    %c0_i32_1 = arith.constant 0 : i32
    return %c0_i32, %c0_i32_0 : i32, i32
  }
  func.func @transform_6(%arg0: i32) -> (i32, i32) {
    %c0_i32 = arith.constant 0 : i32
    %c0_i32_0 = arith.constant 0 : i32
    %c0_i32_1 = arith.constant 0 : i32
    return %c0_i32, %c0_i32_0 : i32, i32
  }
  func.func @transform_7(%arg0: i32) -> (i32, i32) {
    %c0_i32 = arith.constant 0 : i32
    %c0_i32_0 = arith.constant 0 : i32
    return %arg0, %c0_i32 : i32, i32
  }
}

</mosaic_0001>

<bundles_post_ra>
// kernel: _fused_mlp_forward.1
= control target key start
LH: loop header
LB: loop body
LE: loop exit
PB: predicated region body
PF: predicated region fallthrough
CT: control target
= control target key end

     0   :  { %12 = vsyncpa [#allocation3], 0  ;;  %s760_s0 = inlined_call_operand.vmem [shape: bf16[8,128], index: 0, kind: input, shape index: {}]   ;;  %s761_s1 = inlined_call_operand.hbm [shape: bf16[128,128], index: 1, kind: input, shape index: {}]   ;;  %s762_s2 = inlined_call_operand.vmem [shape: f32[1,128], index: 2, kind: input, shape index: {}]   ;;  %s763_s3 = inlined_call_operand.hbm [shape: bf16[128,128], index: 3, kind: input, shape index: {}]   ;;  %s764_s4 = inlined_call_operand.vmem [shape: f32[1,128], index: 4, kind: input, shape index: {}]   ;;  %s765_s5 = inlined_call_operand.hbm [shape: bf16[128,128], index: 5, kind: input, shape index: {}]   ;;  %s766_s6 = inlined_call_operand.vmem [shape: f32[1,128], index: 6, kind: input, shape index: {}]   ;;  %s767_s7 = inlined_call_operand.hbm [shape: f32[8,128], index: 7, kind: output, shape index: {}]  }
   0x1   :  { %13 = vsyncpa [#allocation6], 0 }
   0x2   :  { %14 = vsyncpa [#allocation4], 0  ;;  %s658_s24 = smov [#allocation5]   ;;  %s659_s26 = smov [#allocation2]  }
   0x3   :  { %s36_s25 = sshll.u32 %s658_s24, 4  ;;  %s22_s27 = sshll.u32 %s659_s26, 4  ;;  %s37_s25 = int_to_ptr.vmem [resolvable:$true] %s36_s25  ;;  %s23_s27 = int_to_ptr.vmem [resolvable:$true] %s22_s27 }
   0x4   :  { %s580_s28 = scalar_lea.vmem %s37_s25, 1024  ;;  %p585_p1 = scmp.lt.s32.totalorder %s37_s25, %s37_s25 }
   0x5   :  { %p581_p0 = scmp.ne.s32.totalorder %s37_s25, %s580_s28  ;;  %p586_p2 = scmp.lt.s32.totalorder %s580_s28, %s580_s28 }
   0x7   :  { %p587_p3 = por %p586_p2, %p585_p1 }
   0x9   :  { %p588_p4 = pnand %p587_p3, %p581_p0 }
   0xb   :  { %591 = shalt.err (!%p588_p4)
}
   0xc   :  { %s660_s29 = smov 64   ;;  %s661_s30 = smov 4  }
   0xd   :  { %42 = dma.hbm_to_vmem [thread:$0]  %s763_s3, 1024, %s37_s25, [#allocation6], %s660_s29, %s660_s29, %s661_s30  }
   0xe   :  { %s600_s10 = scalar_lea.vmem %s23_s27, 1024  ;;  %p605_p6 = scmp.lt.s32.totalorder %s23_s27, %s23_s27 }
   0xf   :  { %p601_p5 = scmp.ne.s32.totalorder %s23_s27, %s600_s10  ;;  %p606_p7 = scmp.lt.s32.totalorder %s600_s10, %s600_s10 }
  0x11   :  { %p607_p8 = por %p606_p7, %p605_p6 }
  0x13   :  { %p608_p9 = pnand %p607_p8, %p601_p5 }
  0x15   :  { %611 = shalt.err (!%p608_p9)
}
  0x16   :  { %28 = dma.hbm_to_vmem [thread:$0]  %s761_s1, 1024, %s23_s27, [#allocation3], %s660_s29, %s660_s29, %s661_s30  }
  0x17   :  { %s662_s13 = smov [#allocation7]  }
  0x18   :  { %s50_s14 = sshll.u32 %s662_s13, 4  ;;  %s51_s14 = int_to_ptr.vmem [resolvable:$true] %s50_s14 }
  0x19   :  { %s620_s15 = scalar_lea.vmem %s51_s14, 1024  ;;  %p625_p11 = scmp.lt.s32.totalorder %s51_s14, %s51_s14 }
  0x1a   :  { %p621_p10 = scmp.ne.s32.totalorder %s51_s14, %s620_s15  ;;  %p626_p12 = scmp.lt.s32.totalorder %s620_s15, %s620_s15 }
  0x1c   :  { %p627_p13 = por %p626_p12, %p625_p11 }
  0x1e   :  { %p628_p0 = pnand %p627_p13, %p621_p10 }
  0x20   :  { %631 = shalt.err (!%p628_p0)
}
  0x21   :  { %56 = dma.hbm_to_vmem [thread:$0]  %s765_s5, 1024, %s51_s14, [#allocation6], %s660_s29, %s660_s29, %s661_s30  }
  0x22   :  { %652 = dma.done.wait [#allocation3], 1024  }
  0x23   :  { %653 = vsyncadd [#allocation3], 4294966272 }
  0x24   :  { %654 = dma.done.wait [#allocation6], 2048  }
  0x25   :  { %655 = vsyncadd [#allocation6], 4294965248  ;;  %v663_v0 = vmov 0.0   ;;  %vm664_vm0 = vmmov 0   ;;  %v548_v1 = vld [vmem:[#allocation2 + $0x38] sm:$0xff]   ;;  %v549_v2 = vld [vmem:[#allocation2 + $0x30] sm:$0xff]  }
  0x26   :  { %480 = vmatprep.subr.bf16.mxu0 %v663_v0  ;;  %496 = vmatprep.mubr.msk.bf16.mxu0 %vm664_vm0, %v663_v0  ;;  %v550_v3 = vld [vmem:[#allocation2 + $0x28] sm:$0xff]   ;;  %v556_v4 = vld [vmem:[#allocation5 + $0x38] sm:$0xff]   ;;  %v551_v5 = vld [vmem:[#allocation2 + $0x20] sm:$0xff]   ;;  %s665_s21 = smov [#allocation8]  }
  0x27   :  { %500 = vmatprep.subr.bf16.mxu1 %v663_v0  ;;  %516 = vmatprep.mubr.msk.bf16.mxu1 %vm664_vm0, %v663_v0  ;;  %v557_v6 = vld [vmem:[#allocation5 + $0x30] sm:$0xff]   ;;  %v552_v7 = vld [vmem:[#allocation2 + $0x18] sm:$0xff]   ;;  %v558_v8 = vld [vmem:[#allocation5 + $0x28] sm:$0xff]   ;;  %s416_s22 = sshll.u32 %s665_s21, 4  ;;  %s417_s22 = int_to_ptr.vmem [resolvable:$true] %s416_s22 }
  0x28   :  { %481 = vmatpush3.bf16.msra.mxu0 %v548_v1  ;;  %501 = vmatpush3.bf16.msra.mxu1 %v556_v4  ;;  %v553_v9 = vld [vmem:[#allocation2 + $0x10] sm:$0xff]   ;;  %v559_v10 = vld [vmem:[#allocation5 + $0x20] sm:$0xff]   ;;  %v554_v11 = vld [vmem:[#allocation2 + $0x8] sm:$0xff]   ;;  %p637_p2 = scmp.lt.s32.totalorder %s417_s22, %s417_s22 }
  0x29   :  { %482 = vmatprep.subr.bf16.mxu0 %v663_v0  ;;  %502 = vmatprep.subr.bf16.mxu1 %v663_v0  ;;  %v560_v12 = vld [vmem:[#allocation5 + $0x18] sm:$0xff]   ;;  %v555_v13 = vld [vmem:[#allocation2] sm:$0xff]   ;;  %v561_v14 = vld [vmem:[#allocation5 + $0x10] sm:$0xff]  }
  0x2a   :  { %v69_v15 = vld [vmem:[%s760_s0] sm:$0xf]  ;;  %v562_v16 = vld [vmem:[#allocation5 + $0x8] sm:$0xff]   ;;  %v564_v18 = vld [vmem:[#allocation7 + $0x38] sm:$0xff]  }
  0x2b   :  { %v563_v17 = vld [vmem:[#allocation5] sm:$0xff]   ;;  %v565_v19 = vld [vmem:[#allocation7 + $0x30] sm:$0xff]   ;;  %v566_v20 = vld [vmem:[#allocation7 + $0x28] sm:$0xff]  }
  0x2c   :  { %483 = vmatpush3.bf16.msra.mxu0 %v549_v2  ;;  %503 = vmatpush3.bf16.msra.mxu1 %v557_v6  ;;  %v567_v21 = vld [vmem:[#allocation7 + $0x20] sm:$0xff]   ;;  %v568_v22 = vld [vmem:[#allocation7 + $0x18] sm:$0xff]   ;;  %v569_v23 = vld [vmem:[#allocation7 + $0x10] sm:$0xff]  }
  0x2d   :  { %484 = vmatprep.subr.bf16.mxu0 %v663_v0  ;;  %504 = vmatprep.subr.bf16.mxu1 %v663_v0  ;;  %v426_v24 = vld [vmem:[%s762_s2] ss:$0 sm:$0xff]  ;;  %v570_v33 = vld [vmem:[#allocation7 + $0x8] sm:$0xff]  }
  0x2e   :  { %v571_v34 = vld [vmem:[#allocation7] sm:$0xff]  }
  0x2f   :  { %v435_v35 = vld [vmem:[%s764_s4] ss:$0 sm:$0xff]  ;;  %s632_s4 = scalar_lea.vmem %s417_s22, 128 }
  0x30   :  { %485 = vmatpush3.bf16.msra.mxu0 %v550_v3  ;;  %505 = vmatpush3.bf16.msra.mxu1 %v558_v8  ;;  %v444_v44 = vld [vmem:[%s766_s6] ss:$0 sm:$0xff]  ;;  %p633_p1 = scmp.ne.s32.totalorder %s417_s22, %s632_s4  ;;  %p638_p3 = scmp.lt.s32.totalorder %s632_s4, %s632_s4 }
  0x31   :  { %486 = vmatprep.subr.bf16.mxu0 %v663_v0  ;;  %506 = vmatprep.subr.bf16.mxu1 %v663_v0 }
  0x32   :  { %p639_p4 = por %p638_p3, %p637_p2 }
  0x34   :  { %487 = vmatpush3.bf16.msra.mxu0 %v551_v5  ;;  %507 = vmatpush3.bf16.msra.mxu1 %v559_v10  ;;  %p640_p5 = pnand %p639_p4, %p633_p1 }
  0x35   :  { %488 = vmatprep.subr.bf16.mxu0 %v663_v0  ;;  %508 = vmatprep.subr.bf16.mxu1 %v663_v0 }
  0x38   :  { %489 = vmatpush3.bf16.msra.mxu0 %v552_v7  ;;  %509 = vmatpush3.bf16.msra.mxu1 %v560_v12 }
  0x39   :  { %490 = vmatprep.subr.bf16.mxu0 %v663_v0  ;;  %510 = vmatprep.subr.bf16.mxu1 %v663_v0 }
  0x3c   :  { %491 = vmatpush3.bf16.msra.mxu0 %v553_v9  ;;  %511 = vmatpush3.bf16.msra.mxu1 %v561_v14 }
  0x3d   :  { %492 = vmatprep.subr.bf16.mxu0 %v663_v0  ;;  %512 = vmatprep.subr.bf16.mxu1 %v663_v0 }
  0x40   :  { %493 = vmatpush3.bf16.msra.mxu0 %v554_v11  ;;  %513 = vmatpush3.bf16.msra.mxu1 %v562_v16 }
  0x41   :  { %494 = vmatprep.subr.bf16.mxu0 %v663_v0  ;;  %514 = vmatprep.subr.bf16.mxu1 %v663_v0 }
  0x44   :  { %495 = vmatpush3.bf16.msra.mxu0 %v555_v13  ;;  %515 = vmatpush3.bf16.msra.mxu1 %v563_v17 }
  0x45   :  { %520 = vmatprep.subr.bf16.mxu0 %v663_v0 }
  0x47   :  { %497 = vmatmul.mubr.bf16.vlgmr.msra.gmra.mxu0 %v69_v15 }
  0x48   :  { %536 = vmatprep.mubr.msk.bf16.mxu0 %vm664_vm0, %v663_v0  ;;  %521 = vmatpush3.bf16.msra.mxu0 %v564_v18 }
  0x49   :  { %522 = vmatprep.subr.bf16.mxu0 %v663_v0 }
  0x4c   :  { %523 = vmatpush3.bf16.msra.mxu0 %v565_v19 }
  0x4d   :  { %524 = vmatprep.subr.bf16.mxu0 %v663_v0 }
  0x50   :  { %525 = vmatpush3.bf16.msra.mxu0 %v566_v20 }
  0x51   :  { %526 = vmatprep.subr.bf16.mxu0 %v663_v0 }
  0x54   :  { %527 = vmatpush3.bf16.msra.mxu0 %v567_v21 }
  0x55   :  { %528 = vmatprep.subr.bf16.mxu0 %v663_v0 }
  0x58   :  { %529 = vmatpush3.bf16.msra.mxu0 %v568_v22 }
  0x59   :  { %530 = vmatprep.subr.bf16.mxu0 %v663_v0 }
  0x5c   :  { %531 = vmatpush3.bf16.msra.mxu0 %v569_v23 }
  0x5d   :  { %532 = vmatprep.subr.bf16.mxu0 %v663_v0 }
  0x60   :  { %533 = vmatpush3.bf16.msra.mxu0 %v570_v33 }
  0x61   :  { %534 = vmatprep.subr.bf16.mxu0 %v663_v0 }
  0x64   :  { %535 = vmatpush3.bf16.msra.mxu0 %v571_v34 }
 0x107   :  { %v175_v25 = vpop.f32.mrf.mxu0 }
 0x108   :  { %v176_v26 = vadd.f32 %v426_v24, %v175_v25 }
 0x109   :  { %v498_v27 = vpop.f32.mrf.mxu0 }
 0x10a   :  { %v181_v28 = vmul.f32 0.01, %v176_v26 }
 0x10b   :  { %v178_v29 = vpop.f32.mrf.mxu0 }
 0x10c   :  { %v182_v30 = vmax.f32 %v176_v26, %v181_v28 }
 0x10d   :  { %v499_v31 = vpop.f32.mrf.mxu0 }
 0x10e   :  { %v200_v32 = vpack.c.bf16 %v182_v30, %v182_v30 }
 0x110   :  { %517 = vmatmul.mubr.bf16.vlgmr.msra.gmra.mxu1 %v200_v32 }
 0x1d0   :  { %v289_v36 = vpop.f32.mrf.mxu1 }
 0x1d1   :  { %v290_v37 = vadd.f32 %v435_v35, %v289_v36 }
 0x1d2   :  { %v518_v38 = vpop.f32.mrf.mxu1 }
 0x1d3   :  { %v295_v39 = vmul.f32 0.01, %v290_v37 }
 0x1d4   :  { %v292_v40 = vpop.f32.mrf.mxu1 }
 0x1d5   :  { %v296_v41 = vmax.f32 %v290_v37, %v295_v39 }
 0x1d6   :  { %v519_v42 = vpop.f32.mrf.mxu1 }
 0x1d7   :  { %v314_v43 = vpack.c.bf16 %v296_v41, %v296_v41 }
 0x1d9   :  { %537 = vmatmul.mubr.bf16.vlgmr.msra.gmra.mxu0 %v314_v43 }
 0x299   :  { %v403_v45 = vpop.f32.mrf.mxu0 }
 0x29a   :  { %v404_v46 = vadd.f32 %v444_v44, %v403_v45 }
 0x29b   :  { %v538_v47 = vpop.f32.mrf.mxu0 }
 0x29c   :  { %409 = vst [vmem:[#allocation8] sm:$0xff] %v404_v46 }
 0x29d   :  { %v406_v48 = vpop.f32.mrf.mxu0 }
 0x29e   :  { %643 = shalt.err (!%p640_p5)
}
 0x29f   :  { %419 = dma.vmem_to_hbm [thread:$0]  %s417_s22, 128, %s767_s7, [#allocation4]   ;;  %v539_v49 = vpop.f32.mrf.mxu0 }
 0x2a0   :  { %656 = dma.done.wait [#allocation4], 128  }
 0x2a1   :  { %657 = vsyncadd [#allocation4], 4294967168 }
 0x2a2   :  { %423 = vsyncpa [#allocation3], 1 }
 0x2a3   :  { %424 = vsyncpa [#allocation6], 1 }
 0x2a4   :  { %425 = vsyncpa [#allocation4], 1 }

// kernel: _fused_mlp_forward.1
= control target key start
LH: loop header
LB: loop body
LE: loop exit
PB: predicated region body
PF: predicated region fallthrough
CT: control target
= control target key end

     0   :  { %12 = vsyncpa [#allocation3], 0  ;;  %s760_s0 = inlined_call_operand.vmem [shape: bf16[8,128], index: 0, kind: input, shape index: {}]   ;;  %s761_s1 = inlined_call_operand.hbm [shape: bf16[128,128], index: 1, kind: input, shape index: {}]   ;;  %s762_s2 = inlined_call_operand.vmem [shape: f32[1,128], index: 2, kind: input, shape index: {}]   ;;  %s763_s3 = inlined_call_operand.hbm [shape: bf16[128,128], index: 3, kind: input, shape index: {}]   ;;  %s764_s4 = inlined_call_operand.vmem [shape: f32[1,128], index: 4, kind: input, shape index: {}]   ;;  %s765_s5 = inlined_call_operand.hbm [shape: bf16[128,128], index: 5, kind: input, shape index: {}]   ;;  %s766_s6 = inlined_call_operand.vmem [shape: f32[1,128], index: 6, kind: input, shape index: {}]   ;;  %s767_s7 = inlined_call_operand.hbm [shape: f32[8,128], index: 7, kind: output, shape index: {}]  }
   0x1   :  { %13 = vsyncpa [#allocation6], 0 }
   0x2   :  { %14 = vsyncpa [#allocation4], 0  ;;  %s658_s24 = smov [#allocation5]   ;;  %s659_s26 = smov [#allocation2]  }
   0x3   :  { %s36_s25 = sshll.u32 %s658_s24, 4  ;;  %s22_s27 = sshll.u32 %s659_s26, 4  ;;  %s37_s25 = int_to_ptr.vmem [resolvable:$true] %s36_s25  ;;  %s23_s27 = int_to_ptr.vmem [resolvable:$true] %s22_s27 }
   0x4   :  { %s580_s28 = scalar_lea.vmem %s37_s25, 1024  ;;  %p585_p1 = scmp.lt.s32.totalorder %s37_s25, %s37_s25 }
   0x5   :  { %p581_p0 = scmp.ne.s32.totalorder %s37_s25, %s580_s28  ;;  %p586_p2 = scmp.lt.s32.totalorder %s580_s28, %s580_s28 }
   0x7   :  { %p587_p3 = por %p586_p2, %p585_p1 }
   0x9   :  { %p588_p4 = pnand %p587_p3, %p581_p0 }
   0xb   :  { %591 = shalt.err (!%p588_p4)
}
   0xc   :  { %s660_s29 = smov 64   ;;  %s661_s30 = smov 4  }
   0xd   :  { %42 = dma.hbm_to_vmem [thread:$0]  %s763_s3, 1024, %s37_s25, [#allocation6], %s660_s29, %s660_s29, %s661_s30  }
   0xe   :  { %s600_s10 = scalar_lea.vmem %s23_s27, 1024  ;;  %p605_p6 = scmp.lt.s32.totalorder %s23_s27, %s23_s27 }
   0xf   :  { %p601_p5 = scmp.ne.s32.totalorder %s23_s27, %s600_s10  ;;  %p606_p7 = scmp.lt.s32.totalorder %s600_s10, %s600_s10 }
  0x11   :  { %p607_p8 = por %p606_p7, %p605_p6 }
  0x13   :  { %p608_p9 = pnand %p607_p8, %p601_p5 }
  0x15   :  { %611 = shalt.err (!%p608_p9)
}
  0x16   :  { %28 = dma.hbm_to_vmem [thread:$0]  %s761_s1, 1024, %s23_s27, [#allocation3], %s660_s29, %s660_s29, %s661_s30  }
  0x17   :  { %s662_s13 = smov [#allocation7]  }
  0x18   :  { %s50_s14 = sshll.u32 %s662_s13, 4  ;;  %s51_s14 = int_to_ptr.vmem [resolvable:$true] %s50_s14 }
  0x19   :  { %s620_s15 = scalar_lea.vmem %s51_s14, 1024  ;;  %p625_p11 = scmp.lt.s32.totalorder %s51_s14, %s51_s14 }
  0x1a   :  { %p621_p10 = scmp.ne.s32.totalorder %s51_s14, %s620_s15  ;;  %p626_p12 = scmp.lt.s32.totalorder %s620_s15, %s620_s15 }
  0x1c   :  { %p627_p13 = por %p626_p12, %p625_p11 }
  0x1e   :  { %p628_p0 = pnand %p627_p13, %p621_p10 }
  0x20   :  { %631 = shalt.err (!%p628_p0)
}
  0x21   :  { %56 = dma.hbm_to_vmem [thread:$0]  %s765_s5, 1024, %s51_s14, [#allocation6], %s660_s29, %s660_s29, %s661_s30  }
  0x22   :  { %652 = dma.done.wait [#allocation3], 1024  }
  0x23   :  { %653 = vsyncadd [#allocation3], 4294966272 }
  0x24   :  { %654 = dma.done.wait [#allocation6], 2048  }
  0x25   :  { %655 = vsyncadd [#allocation6], 4294965248  ;;  %v663_v0 = vmov 0.0   ;;  %vm664_vm0 = vmmov 0   ;;  %v548_v1 = vld [vmem:[#allocation2 + $0x38] sm:$0xff]   ;;  %v549_v2 = vld [vmem:[#allocation2 + $0x30] sm:$0xff]  }
  0x26   :  { %480 = vmatprep.subr.bf16.mxu0 %v663_v0  ;;  %496 = vmatprep.mubr.msk.bf16.mxu0 %vm664_vm0, %v663_v0  ;;  %v550_v3 = vld [vmem:[#allocation2 + $0x28] sm:$0xff]   ;;  %v556_v4 = vld [vmem:[#allocation5 + $0x38] sm:$0xff]   ;;  %v551_v5 = vld [vmem:[#allocation2 + $0x20] sm:$0xff]   ;;  %s665_s21 = smov [#allocation8]  }
  0x27   :  { %500 = vmatprep.subr.bf16.mxu1 %v663_v0  ;;  %516 = vmatprep.mubr.msk.bf16.mxu1 %vm664_vm0, %v663_v0  ;;  %v557_v6 = vld [vmem:[#allocation5 + $0x30] sm:$0xff]   ;;  %v552_v7 = vld [vmem:[#allocation2 + $0x18] sm:$0xff]   ;;  %v558_v8 = vld [vmem:[#allocation5 + $0x28] sm:$0xff]   ;;  %s416_s22 = sshll.u32 %s665_s21, 4  ;;  %s417_s22 = int_to_ptr.vmem [resolvable:$true] %s416_s22 }
  0x28   :  { %481 = vmatpush3.bf16.msra.mxu0 %v548_v1  ;;  %501 = vmatpush3.bf16.msra.mxu1 %v556_v4  ;;  %v553_v9 = vld [vmem:[#allocation2 + $0x10] sm:$0xff]   ;;  %v559_v10 = vld [vmem:[#allocation5 + $0x20] sm:$0xff]   ;;  %v554_v11 = vld [vmem:[#allocation2 + $0x8] sm:$0xff]   ;;  %p637_p2 = scmp.lt.s32.totalorder %s417_s22, %s417_s22 }
  0x29   :  { %482 = vmatprep.subr.bf16.mxu0 %v663_v0  ;;  %502 = vmatprep.subr.bf16.mxu1 %v663_v0  ;;  %v560_v12 = vld [vmem:[#allocation5 + $0x18] sm:$0xff]   ;;  %v555_v13 = vld [vmem:[#allocation2] sm:$0xff]   ;;  %v561_v14 = vld [vmem:[#allocation5 + $0x10] sm:$0xff]  }
  0x2a   :  { %v69_v15 = vld [vmem:[%s760_s0] sm:$0xf]  ;;  %v562_v16 = vld [vmem:[#allocation5 + $0x8] sm:$0xff]   ;;  %v564_v18 = vld [vmem:[#allocation7 + $0x38] sm:$0xff]  }
  0x2b   :  { %v563_v17 = vld [vmem:[#allocation5] sm:$0xff]   ;;  %v565_v19 = vld [vmem:[#allocation7 + $0x30] sm:$0xff]   ;;  %v566_v20 = vld [vmem:[#allocation7 + $0x28] sm:$0xff]  }
  0x2c   :  { %483 = vmatpush3.bf16.msra.mxu0 %v549_v2  ;;  %503 = vmatpush3.bf16.msra.mxu1 %v557_v6  ;;  %v567_v21 = vld [vmem:[#allocation7 + $0x20] sm:$0xff]   ;;  %v568_v22 = vld [vmem:[#allocation7 + $0x18] sm:$0xff]   ;;  %v569_v23 = vld [vmem:[#allocation7 + $0x10] sm:$0xff]  }
  0x2d   :  { %484 = vmatprep.subr.bf16.mxu0 %v663_v0  ;;  %504 = vmatprep.subr.bf16.mxu1 %v663_v0  ;;  %v426_v24 = vld [vmem:[%s762_s2] ss:$0 sm:$0xff]  ;;  %v570_v33 = vld [vmem:[#allocation7 + $0x8] sm:$0xff]  }
  0x2e   :  { %v571_v34 = vld [vmem:[#allocation7] sm:$0xff]  }
  0x2f   :  { %v435_v35 = vld [vmem:[%s764_s4] ss:$0 sm:$0xff]  ;;  %s632_s4 = scalar_lea.vmem %s417_s22, 128 }
  0x30   :  { %485 = vmatpush3.bf16.msra.mxu0 %v550_v3  ;;  %505 = vmatpush3.bf16.msra.mxu1 %v558_v8  ;;  %v444_v44 = vld [vmem:[%s766_s6] ss:$0 sm:$0xff]  ;;  %p633_p1 = scmp.ne.s32.totalorder %s417_s22, %s632_s4  ;;  %p638_p3 = scmp.lt.s32.totalorder %s632_s4, %s632_s4 }
  0x31   :  { %486 = vmatprep.subr.bf16.mxu0 %v663_v0  ;;  %506 = vmatprep.subr.bf16.mxu1 %v663_v0 }
  0x32   :  { %p639_p4 = por %p638_p3, %p637_p2 }
  0x34   :  { %487 = vmatpush3.bf16.msra.mxu0 %v551_v5  ;;  %507 = vmatpush3.bf16.msra.mxu1 %v559_v10  ;;  %p640_p5 = pnand %p639_p4, %p633_p1 }
  0x35   :  { %488 = vmatprep.subr.bf16.mxu0 %v663_v0  ;;  %508 = vmatprep.subr.bf16.mxu1 %v663_v0 }
  0x38   :  { %489 = vmatpush3.bf16.msra.mxu0 %v552_v7  ;;  %509 = vmatpush3.bf16.msra.mxu1 %v560_v12 }
  0x39   :  { %490 = vmatprep.subr.bf16.mxu0 %v663_v0  ;;  %510 = vmatprep.subr.bf16.mxu1 %v663_v0 }
  0x3c   :  { %491 = vmatpush3.bf16.msra.mxu0 %v553_v9  ;;  %511 = vmatpush3.bf16.msra.mxu1 %v561_v14 }
  0x3d   :  { %492 = vmatprep.subr.bf16.mxu0 %v663_v0  ;;  %512 = vmatprep.subr.bf16.mxu1 %v663_v0 }
  0x40   :  { %493 = vmatpush3.bf16.msra.mxu0 %v554_v11  ;;  %513 = vmatpush3.bf16.msra.mxu1 %v562_v16 }
  0x41   :  { %494 = vmatprep.subr.bf16.mxu0 %v663_v0  ;;  %514 = vmatprep.subr.bf16.mxu1 %v663_v0 }
  0x44   :  { %495 = vmatpush3.bf16.msra.mxu0 %v555_v13  ;;  %515 = vmatpush3.bf16.msra.mxu1 %v563_v17 }
  0x45   :  { %520 = vmatprep.subr.bf16.mxu0 %v663_v0 }
  0x47   :  { %497 = vmatmul.mubr.bf16.vlgmr.msra.gmra.mxu0 %v69_v15 }
  0x48   :  { %536 = vmatprep.mubr.msk.bf16.mxu0 %vm664_vm0, %v663_v0  ;;  %521 = vmatpush3.bf16.msra.mxu0 %v564_v18 }
  0x49   :  { %522 = vmatprep.subr.bf16.mxu0 %v663_v0 }
  0x4c   :  { %523 = vmatpush3.bf16.msra.mxu0 %v565_v19 }
  0x4d   :  { %524 = vmatprep.subr.bf16.mxu0 %v663_v0 }
  0x50   :  { %525 = vmatpush3.bf16.msra.mxu0 %v566_v20 }
  0x51   :  { %526 = vmatprep.subr.bf16.mxu0 %v663_v0 }
  0x54   :  { %527 = vmatpush3.bf16.msra.mxu0 %v567_v21 }
  0x55   :  { %528 = vmatprep.subr.bf16.mxu0 %v663_v0 }
  0x58   :  { %529 = vmatpush3.bf16.msra.mxu0 %v568_v22 }
  0x59   :  { %530 = vmatprep.subr.bf16.mxu0 %v663_v0 }
  0x5c   :  { %531 = vmatpush3.bf16.msra.mxu0 %v569_v23 }
  0x5d   :  { %532 = vmatprep.subr.bf16.mxu0 %v663_v0 }
  0x60   :  { %533 = vmatpush3.bf16.msra.mxu0 %v570_v33 }
  0x61   :  { %534 = vmatprep.subr.bf16.mxu0 %v663_v0 }
  0x64   :  { %535 = vmatpush3.bf16.msra.mxu0 %v571_v34 }
 0x107   :  { %v175_v25 = vpop.f32.mrf.mxu0 }
 0x108   :  { %v176_v26 = vadd.f32 %v426_v24, %v175_v25 }
 0x109   :  { %v498_v27 = vpop.f32.mrf.mxu0 }
 0x10a   :  { %v181_v28 = vmul.f32 0.01, %v176_v26 }
 0x10b   :  { %v178_v29 = vpop.f32.mrf.mxu0 }
 0x10c   :  { %v182_v30 = vmax.f32 %v176_v26, %v181_v28 }
 0x10d   :  { %v499_v31 = vpop.f32.mrf.mxu0 }
 0x10e   :  { %v200_v32 = vpack.c.bf16 %v182_v30, %v182_v30 }
 0x110   :  { %517 = vmatmul.mubr.bf16.vlgmr.msra.gmra.mxu1 %v200_v32 }
 0x1d0   :  { %v289_v36 = vpop.f32.mrf.mxu1 }
 0x1d1   :  { %v290_v37 = vadd.f32 %v435_v35, %v289_v36 }
 0x1d2   :  { %v518_v38 = vpop.f32.mrf.mxu1 }
 0x1d3   :  { %v295_v39 = vmul.f32 0.01, %v290_v37 }
 0x1d4   :  { %v292_v40 = vpop.f32.mrf.mxu1 }
 0x1d5   :  { %v296_v41 = vmax.f32 %v290_v37, %v295_v39 }
 0x1d6   :  { %v519_v42 = vpop.f32.mrf.mxu1 }
 0x1d7   :  { %v314_v43 = vpack.c.bf16 %v296_v41, %v296_v41 }
 0x1d9   :  { %537 = vmatmul.mubr.bf16.vlgmr.msra.gmra.mxu0 %v314_v43 }
 0x299   :  { %v403_v45 = vpop.f32.mrf.mxu0 }
 0x29a   :  { %v404_v46 = vadd.f32 %v444_v44, %v403_v45 }
 0x29b   :  { %v538_v47 = vpop.f32.mrf.mxu0 }
 0x29c   :  { %409 = vst [vmem:[#allocation8] sm:$0xff] %v404_v46 }
 0x29d   :  { %v406_v48 = vpop.f32.mrf.mxu0 }
 0x29e   :  { %643 = shalt.err (!%p640_p5)
}
 0x29f   :  { %419 = dma.vmem_to_hbm [thread:$0]  %s417_s22, 128, %s767_s7, [#allocation4]   ;;  %v539_v49 = vpop.f32.mrf.mxu0 }
 0x2a0   :  { %656 = dma.done.wait [#allocation4], 128  }
 0x2a1   :  { %657 = vsyncadd [#allocation4], 4294967168 }
 0x2a2   :  { %423 = vsyncpa [#allocation3], 1 }
 0x2a3   :  { %424 = vsyncpa [#allocation6], 1 }
 0x2a4   :  { %425 = vsyncpa [#allocation4], 1 }

</bundles_post_ra>
